<compile_context>
chip_gen: v7x
topology: tpu7x:2x2x1
jax: 0.10.0
libtpu: 0.0.40
codegen_flags: <defaults>
</compile_context>

<pallas_src>
import functools

import jax
import jax.numpy as jnp
from jax import lax
from jax.experimental import pallas as pl
from jax.experimental.pallas import tpu as pltpu


def _neta_kernel(x_ref, y_ref, w1x_ref, w1y_ref, b1_ref, w2_ref, b2_ref, o_ref):
    # fc1 on the MXU in bf16 with f32 accumulation:
    #   (Hp, d1) . (tm, d1)^T  +  (Hp, d2) . (tm, d2)^T  ->  (Hp, tm)
    # Batch on lanes -> lane-dense (1, tm) output store.
    nt = (((1,), (1,)), ((), ()))  # contract last dim of both operands
    hx = lax.dot_general(w1x_ref[...], x_ref[...].astype(jnp.bfloat16), nt,
                         preferred_element_type=jnp.float32)
    hy = lax.dot_general(w1y_ref[...], y_ref[...].astype(jnp.bfloat16), nt,
                         preferred_element_type=jnp.float32)
    h = jnp.maximum(hx + hy + b1_ref[...], 0.0)        # (Hp,1) bias broadcasts over lanes
    # fc2: VPU multiply by w2 column + cross-sublane (XLU) reduce -> (1, tm);
    # b2 is a scalar read from SMEM.
    o_ref[...] = jnp.sum(h * w2_ref[...], axis=0, keepdims=True) + b2_ref[0]


def prepare_params(w1, b1, w2, b2, input_size1):
    """One-time preprocessing into the kernel-ready (padded, transposed, bf16) layout.

    w1: (d1+d2, H) (transposed PyTorch fc1.weight), b1: (H,), w2: (H, 1), b2: (1,).
    """
    _, H = w1.shape
    Hp = ((H + 127) // 128) * 128
    pad = Hp - H
    w1p = jnp.pad(w1, ((0, 0), (0, pad)))                              # (K, Hp)
    w1x = w1p[:input_size1].T.astype(jnp.bfloat16)                     # (Hp, d1)
    w1y = w1p[input_size1:].T.astype(jnp.bfloat16)                     # (Hp, d2)
    b1c = jnp.pad(b1, (0, pad)).reshape(Hp, 1).astype(jnp.float32)     # (Hp, 1)
    w2c = jnp.pad(w2, ((0, pad), (0, 0))).astype(jnp.float32)          # (Hp, 1)
    b2c = b2.reshape(1).astype(jnp.float32)                            # (1,) -> SMEM
    return {"w1x": w1x, "w1y": w1y, "b1": b1c, "w2": w2c, "b2": b2c}


@functools.partial(jax.jit, static_argnames=("tm",))
def neta_forward(params, x, y, *, tm=None):
    """x: (B, d1), y: (B, d2); params from prepare_params. Returns (B, 1)."""
    B, d1 = x.shape
    d2 = y.shape[1]
    Hp = params["w1x"].shape[0]

    # Adaptive batch tile: big tiles amortize per-step overhead; keep >= 2 tiles
    # whenever b_pad >= 256 so v7x's two TensorCores both get work.
    if tm is None:
        bp128 = pl.cdiv(B, 128) * 128
        tm = bp128 if bp128 < 256 else min(2048, (bp128 // 2) // 128 * 128)
    n_tiles = pl.cdiv(B, tm)
    b_pad = n_tiles * tm
    if b_pad != B:
        x = jnp.pad(x, ((0, b_pad - B), (0, 0)))
        y = jnp.pad(y, ((0, b_pad - B), (0, 0)))

    out = pl.pallas_call(
        _neta_kernel,
        out_shape=jax.ShapeDtypeStruct((1, b_pad), jnp.float32),
        grid=(n_tiles,),
        in_specs=[
            pl.BlockSpec((tm, d1), lambda i: (i, 0)),      # x: batch-tiled, natural layout
            pl.BlockSpec((tm, d2), lambda i: (i, 0)),      # y
            pl.BlockSpec((Hp, d1), lambda i: (0, 0)),      # w1 halves: VMEM-resident
            pl.BlockSpec((Hp, d2), lambda i: (0, 0)),
            pl.BlockSpec((Hp, 1), lambda i: (0, 0)),       # b1
            pl.BlockSpec((Hp, 1), lambda i: (0, 0)),       # w2
            pl.BlockSpec(memory_space=pltpu.MemorySpace.SMEM),   # b2 scalar
        ],
        out_specs=pl.BlockSpec((1, tm), lambda i: (0, i)), # lane-dense output slab
        compiler_params=pltpu.CompilerParams(
            dimension_semantics=("parallel",)),            # v7x: split batch over 2 TCs
    )(x, y, params["w1x"], params["w1y"], params["b1"], params["w2"], params["b2"])

    # Back to the module's (B, 1); skip the slice when no batch padding was added.
    res = out[0] if b_pad == B else out[0, :B]
    return res[:, None]


def init_params(key, input_size1=32, input_size2=32, hidden_size1=100):
    """Matches NetA.__init__: normal(std=0.02) weights, zero biases.

    PyTorch stores fc.weight as (out, in); we keep the transposed (in, out)
    layout for right-multiplication.
    """
    k1, k2 = jax.random.split(key)
    in_dim = input_size1 + input_size2
    w1 = (0.02 * jax.random.normal(k1, (hidden_size1, in_dim), jnp.float32)).T  # (in, H)
    b1 = jnp.zeros((hidden_size1,), jnp.float32)
    w2 = (0.02 * jax.random.normal(k2, (1, hidden_size1), jnp.float32)).T       # (H, 1)
    b2 = jnp.zeros((1,), jnp.float32)
    return w1, b1, w2, b2


if __name__ == "__main__":
    key = jax.random.PRNGKey(0)
    kx, ky, kp = jax.random.split(key, 3)

    B, d1, d2, H = 256, 32, 32, 100
    x = jax.random.normal(kx, (B, d1), jnp.float32)
    y = jax.random.normal(ky, (B, d2), jnp.float32)
    w1, b1, w2, b2 = init_params(kp, d1, d2, H)
    params = prepare_params(w1, b1, w2, b2, input_size1=d1)   # one-time, kernel-ready

    out = jax.block_until_ready(neta_forward(params, x, y))
    assert out.shape == (B, 1)

    xy = jnp.concatenate([x, y], axis=1)

    # Reference with operands rounded to bf16 (matches the kernel's MXU precision).
    xy_r = xy.astype(jnp.bfloat16).astype(jnp.float32)
    w1_r = w1.astype(jnp.bfloat16).astype(jnp.float32)
    ref_r = jnp.maximum(xy_r @ w1_r + b1, 0.0) @ w2 + b2
    assert jnp.allclose(out, ref_r, atol=1e-4), float(jnp.max(jnp.abs(out - ref_r)))

    # Full-f32 reference (loose tolerance because fc1 operands are bf16 in-kernel).
    ref = jnp.maximum(xy @ w1 + b1, 0.0) @ w2 + b2
    assert jnp.allclose(out, ref, atol=5e-3, rtol=1e-2), float(jnp.max(jnp.abs(out - ref)))

    print("KERNEL_OK")
</pallas_src>

<mosaic_0001>
module attributes {stable_mosaic.version = 11 : i64} {
  func.func @_neta_kernel(%arg0: i32, %arg1: memref<128x32xf32, #tpu.memory_space<vmem>>, %arg2: memref<128x32xf32, #tpu.memory_space<vmem>>, %arg3: memref<128x32xbf16, #tpu.memory_space<vmem>>, %arg4: memref<128x32xbf16, #tpu.memory_space<vmem>>, %arg5: memref<128x1xf32, #tpu.memory_space<vmem>>, %arg6: memref<128x1xf32, #tpu.memory_space<vmem>>, %arg7: memref<1xf32, #tpu.memory_space<smem>>, %arg8: memref<1x128xf32, #tpu.memory_space<vmem>>) attributes {dimension_semantics = [#tpu.dimension_semantics<parallel>], iteration_bounds = array<i64: 2>, scalar_prefetch = 0 : i64, scratch_operands = 0 : i64, tpu.core_type = #tpu.core_type<tc>, window_params = [{transform_indices = @transform_0, window_bounds = array<i64: 128, 32>}, {transform_indices = @transform_1, window_bounds = array<i64: 128, 32>}, {pipeline_mode = #tpu.pipeline_mode<synchronous>, transform_indices = @transform_2, window_bounds = array<i64: 128, 32>}, {pipeline_mode = #tpu.pipeline_mode<synchronous>, transform_indices = @transform_3, window_bounds = array<i64: 128, 32>}, {pipeline_mode = #tpu.pipeline_mode<synchronous>, transform_indices = @transform_4, window_bounds = array<i64: 128, 1>}, {pipeline_mode = #tpu.pipeline_mode<synchronous>, transform_indices = @transform_5, window_bounds = array<i64: 128, 1>}, {transform_indices = @transform_6, window_bounds = array<i64: 1>}, {transform_indices = @transform_7, window_bounds = array<i64: 1, 128>}]} {
    %c0 = arith.constant 0 : index
    %c0_0 = arith.constant 0 : index
    %0 = vector.load %arg3[%c0, %c0_0] : memref<128x32xbf16, #tpu.memory_space<vmem>>, vector<128x32xbf16>
    %c0_1 = arith.constant 0 : index
    %c0_2 = arith.constant 0 : index
    %1 = vector.load %arg1[%c0_1, %c0_2] : memref<128x32xf32, #tpu.memory_space<vmem>>, vector<128x32xf32>
    %2 = arith.truncf %1 : vector<128x32xf32> to vector<128x32xbf16>
    %cst = arith.constant dense<0.000000e+00> : vector<128x128xf32>
    %3 = tpu.matmul %0, %2, %cst {dimension_numbers = #tpu.dot_dimension_numbers<[1], [1], [0], [0], [0, 0, 1, 0], [], []>} : vector<128x32xbf16>, vector<128x32xbf16>, vector<128x128xf32> -> vector<128x128xf32>
    %c0_3 = arith.constant 0 : index
    %c0_4 = arith.constant 0 : index
    %4 = vector.load %arg4[%c0_3, %c0_4] : memref<128x32xbf16, #tpu.memory_space<vmem>>, vector<128x32xbf16>
    %c0_5 = arith.constant 0 : index
    %c0_6 = arith.constant 0 : index
    %5 = vector.load %arg2[%c0_5, %c0_6] : memref<128x32xf32, #tpu.memory_space<vmem>>, vector<128x32xf32>
    %6 = arith.truncf %5 : vector<128x32xf32> to vector<128x32xbf16>
    %cst_7 = arith.constant dense<0.000000e+00> : vector<128x128xf32>
    %7 = tpu.matmul %4, %6, %cst_7 {dimension_numbers = #tpu.dot_dimension_numbers<[1], [1], [0], [0], [0, 0, 1, 0], [], []>} : vector<128x32xbf16>, vector<128x32xbf16>, vector<128x128xf32> -> vector<128x128xf32>
    %8 = arith.addf %3, %7 : vector<128x128xf32>
    %c0_8 = arith.constant 0 : index
    %c0_9 = arith.constant 0 : index
    %9 = vector.load %arg5[%c0_8, %c0_9] : memref<128x1xf32, #tpu.memory_space<vmem>>, vector<128x1xf32>
    %10 = vector.broadcast %9 : vector<128x1xf32> to vector<128x128xf32>
    %11 = arith.addf %8, %10 : vector<128x128xf32>
    %cst_10 = arith.constant 0.000000e+00 : f32
    %12 = vector.broadcast %cst_10 : f32 to vector<128x128xf32>
    %13 = arith.maximumf %11, %12 : vector<128x128xf32>
    %c0_11 = arith.constant 0 : index
    %c0_12 = arith.constant 0 : index
    %14 = vector.load %arg6[%c0_11, %c0_12] : memref<128x1xf32, #tpu.memory_space<vmem>>, vector<128x1xf32>
    %15 = vector.broadcast %14 : vector<128x1xf32> to vector<128x128xf32>
    %16 = arith.mulf %13, %15 : vector<128x128xf32>
    %cst_13 = arith.constant dense<0.000000e+00> : vector<128xf32>
    %17 = vector.multi_reduction <add>, %16, %cst_13 [0] : vector<128x128xf32> to vector<128xf32>
    %18 = vector.shape_cast %17 : vector<128xf32> to vector<1x128xf32>
    %c0_14 = arith.constant 0 : index
    %19 = memref.load %arg7[%c0_14] : memref<1xf32, #tpu.memory_space<smem>>
    %20 = vector.broadcast %19 : f32 to vector<1x128xf32>
    %21 = arith.addf %18, %20 : vector<1x128xf32>
    %c0_15 = arith.constant 0 : index
    %c0_16 = arith.constant 0 : index
    %22 = vector.load %arg8[%c0_15, %c0_16] : memref<1x128xf32, #tpu.memory_space<vmem>>, vector<1x128xf32>
    tpu.vector_store %arg8[%c0_15, %c0_16], %21 {strides = array<i32>} : memref<1x128xf32, #tpu.memory_space<vmem>>, vector<1x128xf32>,
    return
  }
  func.func @transform_0(%arg0: i32) -> (i32, i32) {
    %c0_i32 = arith.constant 0 : i32
    %c0_i32_0 = arith.constant 0 : i32
    return %arg0, %c0_i32 : i32, i32
  }
  func.func @transform_1(%arg0: i32) -> (i32, i32) {
    %c0_i32 = arith.constant 0 : i32
    %c0_i32_0 = arith.constant 0 : i32
    return %arg0, %c0_i32 : i32, i32
  }
  func.func @transform_2(%arg0: i32) -> (i32, i32) {
    %c0_i32 = arith.constant 0 : i32
    %c0_i32_0 = arith.constant 0 : i32
    %c0_i32_1 = arith.constant 0 : i32
    return %c0_i32, %c0_i32_0 : i32, i32
  }
  func.func @transform_3(%arg0: i32) -> (i32, i32) {
    %c0_i32 = arith.constant 0 : i32
    %c0_i32_0 = arith.constant 0 : i32
    %c0_i32_1 = arith.constant 0 : i32
    return %c0_i32, %c0_i32_0 : i32, i32
  }
  func.func @transform_4(%arg0: i32) -> (i32, i32) {
    %c0_i32 = arith.constant 0 : i32
    %c0_i32_0 = arith.constant 0 : i32
    %c0_i32_1 = arith.constant 0 : i32
    return %c0_i32, %c0_i32_0 : i32, i32
  }
  func.func @transform_5(%arg0: i32) -> (i32, i32) {
    %c0_i32 = arith.constant 0 : i32
    %c0_i32_0 = arith.constant 0 : i32
    %c0_i32_1 = arith.constant 0 : i32
    return %c0_i32, %c0_i32_0 : i32, i32
  }
  func.func @transform_6(%arg0: i32) -> i32 {
    %c0_i32 = arith.constant 0 : i32
    %c0_i32_0 = arith.constant 0 : i32
    return %c0_i32 : i32
  }
  func.func @transform_7(%arg0: i32) -> (i32, i32) {
    %c0_i32 = arith.constant 0 : i32
    %c0_i32_0 = arith.constant 0 : i32
    return %c0_i32, %arg0 : i32, i32
  }
}

</mosaic_0001>

<bundles_post_ra>
// kernel: neta_forward.1
= control target key start
LH: loop header
LB: loop body
LE: loop exit
PB: predicated region body
PF: predicated region fallthrough
CT: control target
= control target key end

     0   :  { %s1802_s0 = inlined_call_operand.vmem [shape: f32[256,32], index: 0, kind: input, shape index: {}]   ;;  %s1803_s1 = inlined_call_operand.vmem [shape: f32[256,32], index: 1, kind: input, shape index: {}]   ;;  %s1804_s2 = inlined_call_operand.vmem [shape: bf16[128,32], index: 2, kind: input, shape index: {}]   ;;  %s1805_s3 = inlined_call_operand.vmem [shape: bf16[128,32], index: 3, kind: input, shape index: {}]   ;;  %s1806_s4 = inlined_call_operand.vmem [shape: f32[128,1], index: 4, kind: input, shape index: {}]   ;;  %s1807_s5 = inlined_call_operand.vmem [shape: f32[128,1], index: 5, kind: input, shape index: {}]   ;;  %s1808_s6 = inlined_call_operand.<no memory space> [shape: f32[1], index: 6, kind: input, shape index: {}]   ;;  %s1809_s7 = inlined_call_operand.hbm [shape: f32[1,256], index: 7, kind: output, shape index: {}]  }
   0x1   :  { %12 = sst [smem:[#allocation2]] %s1808_s6 }
   0x2   :  { %13 = vsyncpa [#allocation4], 0 }
   0x3   :  { %15 = vsyncpa [#allocation4 + $0x1], 0  ;;  %s1436_s26 = smov 0   ;;  %s1438_s27 = smov 0  }
   0x4   :  { %s1440_s28 = smov 0   ;;  %s1442_s29 = smov 0  }
   0x5 LB: > { %s1097_s6 = sadd.s32 4294967295, %s1389_s29   ;;  %s1098_s30 = sadd.s32 4294967294, %s1389_s29   ;;  %s1389_s29 = sphi %s1442_s29, %s1815_s29   ;;  %s1385_s28 = sphi %s1440_s28, %s1814_s28   ;;  %s1381_s27 = sphi %s1438_s27, %s1813_s27   ;;  %s1377_s26 = sphi %s1436_s26, %s1812_s26  }
   0x6   : > { %s1459_s8 = sadd.s32 1, %s1389_s29   ;;  %s185_s9 = sadd.s32 1, %s1385_s28 }
   0x7   : > { %s182_s10 = ssub.s32 %s1389_s29, %s1459_s8  ;;  %p195_p0 = scmp.ne.s32.totalorder %s1385_s28, %s1381_s27 }
   0x8   : > { %p183_p1 = scmp.eq.s32.totalorder %s182_s10, 0  ;;  %p196_p2 = scmp.eq.s32.totalorder %s1097_s6, 1 }
   0x9   : > { %p201_p3 = scmp.ne.s32.totalorder %s1381_s27, %s1377_s26  ;;  %p202_p4 = scmp.eq.s32.totalorder %s1098_s30, 1 }
   0xa   : > { %s1469_s11 = scalar_select %p183_p1, %s1385_s28, %s185_s9  }
   0xb   : > { %p1471_p5 = por %p196_p2, %p195_p0  ;;  %p1475_p6 = por %p202_p4, %p201_p3 }
   0xc   : > { %p1101_p7 = scmp.ge.s32.totalorder %s1389_s29, 1  ;;  %p253_p8 = scmp.lt.s32.totalorder %s1389_s29, 3 }
   0xe   : > { %p254_p9 = pnand %p1101_p7, %p253_p8 }
   0xf   : > { %s1481_s14 = sshll.u32 (!%p254_p9), %s1097_s6, 4  ;;  %v753_v0 = vld [vmem:[%s1806_s4] sm:$0xff] (!%p254_p9)  ;;  %v1391_v1 = vmov (!%p254_p9), 0   ;;  %vm422_vm0 = vcmask (!%p254_p9), 261120   ;;  %v755_v4 = vld [vmem:[%s1806_s4 + $0x10] sm:$0xff] (!%p254_p9)  ;;  %v754_v5 = vld [vmem:[%s1806_s4 + $0x8] sm:$0xff] (!%p254_p9) }
  0x10   : > { %257 = sbr.rel (%p254_p9) target bundleno = 376 (0x178), region = 48  ;;  %p290_p10 = scmp.lt.s32.totalorder (!%p254_p9), %s1481_s14, 31  ;;  %1309 = vset.pattern.permute.xlu0 (!%p254_p9), %v1391_v1  ;;  %v1311_v2 = vld [vmem:[%s1805_s3] sm:$0xff] (!%p254_p9)   ;;  %1310 = vset.pattern.permute.xlu1 (!%p254_p9), %v1391_v1  ;;  %v756_v6 = vld [vmem:[%s1806_s4 + $0x18] sm:$0xff] (!%p254_p9)  ;;  %v882_v32 = vld [vmem:[%s1807_s5 + $0x8] sm:$0xff] (!%p254_p9) }
  0x11   : > { %771 = vperm.xlu0 (!%p254_p9), %1309, %v753_v0   ;;  %v1312_v3 = vld [vmem:[%s1804_s2] sm:$0xff] (!%p254_p9)   ;;  %1189 = vmatprep.mubr.msk.bf16.mxu1 (!%p254_p9), %vm422_vm0, %v1311_v2  ;;  %v883_v36 = vld [vmem:[%s1807_s5 + $0x10] sm:$0xff] (!%p254_p9)  ;;  %v758_v37 = vld [vmem:[%s1806_s4 + $0x28] sm:$0xff] (!%p254_p9)  ;;  %s1014_s20 = sld [smem:[#allocation2]] (!%p254_p9)  ;;  %s1392_s30 = smov (!%p254_p9), [#allocation3]  }
  0x12   : > { %1221 = vmatprep.mubr.msk.bf16.mxu0 (!%p254_p9), %vm422_vm0, %v1312_v3  ;;  %781 = vperm.xlu1 (!%p254_p9), %1310, %v755_v4   ;;  %v881_v7 = vld [vmem:[%s1807_s5] sm:$0xff] (!%p254_p9)  ;;  %v884_v42 = vld [vmem:[%s1807_s5 + $0x18] sm:$0xff] (!%p254_p9)  ;;  %v759_v45 = vld [vmem:[%s1806_s4 + $0x30] sm:$0xff] (!%p254_p9)  ;;  %s1331_s9 = sshll.u32 (!%p254_p9), %s1392_s30, 4  ;;  %s1332_s9 = int_to_ptr.vmem [resolvable:$false] %s1331_s9 }
  0x13   : > { %v757_v35 = vld [vmem:[%s1806_s4 + $0x20] sm:$0xff] (!%p254_p9)  ;;  %v760_v49 = vld [vmem:[%s1806_s4 + $0x38] sm:$0xff] (!%p254_p9)  ;;  %v886_v54 = vld [vmem:[%s1807_s5 + $0x28] sm:$0xff] (!%p254_p9)  ;;  %s1333_s10 = scalar_lea.vmem (!%p254_p9), %s1332_s9, 32 }
  0x14   : > { %v885_v48 = vld [vmem:[%s1807_s5 + $0x20] sm:$0xff] (!%p254_p9)  ;;  %v887_v60 = vld [vmem:[%s1807_s5 + $0x30] sm:$0xff] (!%p254_p9)  ;;  %v762_v61 = vld [vmem:[%s1806_s4 + $0x48] sm:$0xff] (!%p254_p9) }
  0x15   : > { %776 = vperm.xlu0 (!%p254_p9), %1309, %v754_v5   ;;  %v761_v55 = vld [vmem:[%s1806_s4 + $0x40] sm:$0xff] (!%p254_p9)  ;;  %v888_v2 = vld [vmem:[%s1807_s5 + $0x38] sm:$0xff] (!%p254_p9)  ;;  %v763_v3 = vld [vmem:[%s1806_s4 + $0x50] sm:$0xff] (!%p254_p9) }
  0x16   : > { %786 = vperm.xlu1 (!%p254_p9), %1310, %v756_v6  }
  0x17   : > { %s291_s21 = scalar_select %p290_p10, %s1481_s14, 31 }
  0x19   : > { %s1103_s24 = sshll.u32 %s291_s21, 3  ;;  %899 = vperm.xlu0 %1309, %v881_v7   ;;  %s287_s21 = sand.u32 1, %s1381_s27  }
  0x1a   : > { %s1508_s16 = scalar_lea.vmem %s1803_s1, %s1103_s24  ;;  %s1513_s19 = scalar_lea.vmem %s1802_s0, %s1103_s24  ;;  %904 = vperm.xlu1 %1310, %v882_v32   ;;  %v894_v32 = vld [vmem:[%s1807_s5 + $0x68] sm:$0xff] }
  0x1b   : > { %v358_v8 = vld [vmem:[%s1508_s16] sm:$0xff]  ;;  %v359_v9 = vld [vmem:[%s1508_s16 + $0x8] sm:$0xff]  ;;  %v360_v13 = vld [vmem:[%s1508_s16 + $0x10] sm:$0xff]  ;;  %s288_s22 = scalar_lea.vmem [#allocation3], %s287_s21  ;;  %s1760_s24 = scalar_lea.hbm %s1809_s7, %s1481_s14 }
  0x1c   : > { %v318_v10 = vld [vmem:[%s1513_s19] sm:$0xff]  ;;  %v374_v11 = vpack.c.bf16 %v359_v9, %v358_v8  ;;  %v319_v12 = vld [vmem:[%s1513_s19 + $0x8] sm:$0xff]  ;;  %v361_v14 = vld [vmem:[%s1508_s16 + $0x18] sm:$0xff]  ;;  %s1019_s25 = scalar_lea.sflag [#allocation4], %s287_s21 }
  0x1d   : > { %v334_v15 = vpack.c.bf16 %v319_v12, %v318_v10  ;;  %v375_v16 = vpack.c.bf16 %v361_v14, %v360_v13  ;;  %v320_v17 = vld [vmem:[%s1513_s19 + $0x10] sm:$0xff]  ;;  %v321_v18 = vld [vmem:[%s1513_s19 + $0x18] sm:$0xff]  ;;  %v362_v22 = vld [vmem:[%s1508_s16 + $0x20] sm:$0xff]  ;;  %791 = vperm.xlu0 %1309, %v757_v35  }
  0x1e   : > { %1253 = vmatprep.subr.msk.bf16.mxu1 %vm422_vm0, %v374_v11  ;;  %v448_v19 = vsel %vm422_vm0, %v374_v11, 0  ;;  %v335_v20 = vpack.c.bf16 %v321_v18, %v320_v17  ;;  %v363_v23 = vld [vmem:[%s1508_s16 + $0x28] sm:$0xff]  ;;  %v322_v24 = vld [vmem:[%s1513_s19 + $0x20] sm:$0xff]  ;;  %v364_v30 = vld [vmem:[%s1508_s16 + $0x30] sm:$0xff]  ;;  %909 = vperm.xlu1 %1310, %v883_v36  }
  0x1f   : > { %1261 = vmatprep.subr.msk.bf16.mxu0 %vm422_vm0, %v334_v15  ;;  %1174 = vmatpush3.bf16.xpose.msra.mxu1 %v448_v19  ;;  %v633_v21 = vsel %vm422_vm0, %v334_v15, 0  ;;  %v323_v25 = vld [vmem:[%s1513_s19 + $0x28] sm:$0xff]  ;;  %v451_v26 = vsel %vm422_vm0, %v375_v16, 0  ;;  %v376_v27 = vpack.c.bf16 %v363_v23, %v362_v22  ;;  %v365_v31 = vld [vmem:[%s1508_s16 + $0x38] sm:$0xff]  ;;  %v324_v33 = vld [vmem:[%s1513_s19 + $0x30] sm:$0xff] }
  0x20   : > { %1206 = vmatpush3.bf16.xpose.msra.mxu0 %v633_v21  ;;  %1254 = vmatprep.subr.msk.bf16.mxu1 %vm422_vm0, %v375_v16  ;;  %v636_v28 = vsel %vm422_vm0, %v335_v20, 0  ;;  %v336_v29 = vpack.c.bf16 %v323_v25, %v322_v24  ;;  %v325_v34 = vld [vmem:[%s1513_s19 + $0x38] sm:$0xff]  ;;  %v377_v39 = vpack.c.bf16 %v365_v31, %v364_v30  ;;  %v366_v43 = vld [vmem:[%s1508_s16 + $0x40] sm:$0xff]  ;;  %v367_v44 = vld [vmem:[%s1508_s16 + $0x48] sm:$0xff] }
  0x21   : > { %1262 = vmatprep.subr.msk.bf16.mxu0 %vm422_vm0, %v335_v20  ;;  %v454_v38 = vsel %vm422_vm0, %v376_v27, 0  ;;  %v337_v41 = vpack.c.bf16 %v325_v34, %v324_v33  ;;  %796 = vperm.xlu0 %1309, %v758_v37   ;;  %v326_v46 = vld [vmem:[%s1513_s19 + $0x40] sm:$0xff]  ;;  %v327_v47 = vld [vmem:[%s1513_s19 + $0x48] sm:$0xff]  ;;  %v378_v51 = vpack.c.bf16 %v367_v44, %v366_v43  ;;  %v368_v56 = vld [vmem:[%s1508_s16 + $0x50] sm:$0xff] }
  0x22   : > { %v639_v40 = vsel %vm422_vm0, %v336_v29, 0  ;;  %914 = vperm.xlu1 %1310, %v884_v42   ;;  %v457_v50 = vsel %vm422_vm0, %v377_v39, 0  ;;  %v338_v53 = vpack.c.bf16 %v327_v47, %v326_v46  ;;  %v369_v57 = vld [vmem:[%s1508_s16 + $0x58] sm:$0xff]  ;;  %v328_v58 = vld [vmem:[%s1513_s19 + $0x50] sm:$0xff]  ;;  %v370_v4 = vld [vmem:[%s1508_s16 + $0x60] sm:$0xff] }
  0x23   : > { %v642_v52 = vsel %vm422_vm0, %v337_v41, 0  ;;  %v329_v59 = vld [vmem:[%s1513_s19 + $0x58] sm:$0xff]  ;;  %v460_v62 = vsel %vm422_vm0, %v378_v51, 0  ;;  %v379_v63 = vpack.c.bf16 %v369_v57, %v368_v56  ;;  %v371_v5 = vld [vmem:[%s1508_s16 + $0x68] sm:$0xff]  ;;  %v330_v6 = vld [vmem:[%s1513_s19 + $0x60] sm:$0xff] }
  0x24   : > { %v645_v0 = vsel %vm422_vm0, %v338_v53, 0  ;;  %v339_v1 = vpack.c.bf16 %v329_v59, %v328_v58  ;;  %v331_v7 = vld [vmem:[%s1513_s19 + $0x68] sm:$0xff]  ;;  %v889_v8 = vld [vmem:[%s1807_s5 + $0x40] sm:$0xff]  ;;  %v764_v9 = vld [vmem:[%s1806_s4 + $0x58] sm:$0xff]  ;;  %v380_v11 = vpack.c.bf16 %v371_v5, %v370_v4 }
  0x25   : > { %801 = vperm.xlu0 %1309, %v759_v45   ;;  %v463_v10 = vsel %vm422_vm0, %v379_v63, 0  ;;  %v340_v13 = vpack.c.bf16 %v331_v7, %v330_v6  ;;  %v890_v14 = vld [vmem:[%s1807_s5 + $0x48] sm:$0xff]  ;;  %v765_v15 = vld [vmem:[%s1806_s4 + $0x60] sm:$0xff]  ;;  %v372_v16 = vld [vmem:[%s1508_s16 + $0x70] sm:$0xff] }
  0x26   : > { %919 = vperm.xlu1 %1310, %v885_v48   ;;  %v648_v12 = vsel %vm422_vm0, %v339_v1, 0  ;;  %v373_v17 = vld [vmem:[%s1508_s16 + $0x78] sm:$0xff]  ;;  %v332_v18 = vld [vmem:[%s1513_s19 + $0x70] sm:$0xff]  ;;  %v766_v21 = vld [vmem:[%s1806_s4 + $0x68] sm:$0xff]  ;;  %v466_v22 = vsel %vm422_vm0, %v380_v11, 0  ;;  %s1031_s16 = sshll.u32 %s288_s22, 4  ;;  %s1762_s16 = int_to_ptr.vmem [resolvable:$true] %s1031_s16 }
  0x27   : > { %1176 = vmatpush3.bf16.xpose.msra.mxu1 %v451_v26  ;;  %v333_v19 = vld [vmem:[%s1513_s19 + $0x78] sm:$0xff]  ;;  %v891_v20 = vld [vmem:[%s1807_s5 + $0x50] sm:$0xff]  ;;  %v381_v23 = vpack.c.bf16 %v373_v17, %v372_v16  ;;  %v651_v24 = vsel %vm422_vm0, %v340_v13, 0  ;;  %v1313_v34 = vld [vmem:[%s1805_s3 + $0x8] sm:$0xff]   ;;  %s1327_s6 = scalar_lea.vmem %s1762_s16, 16  ;;  %p1334_p0 = scmp.lt.s32.totalorder %s1762_s16, %s1332_s9 }
  0x28   : > { %1208 = vmatpush3.bf16.xpose.msra.mxu0 %v636_v28  ;;  %1255 = vmatprep.subr.msk.bf16.mxu1 %vm422_vm0, %v376_v27  ;;  %v341_v25 = vpack.c.bf16 %v333_v19, %v332_v18  ;;  %v892_v26 = vld [vmem:[%s1807_s5 + $0x58] sm:$0xff]  ;;  %v767_v27 = vld [vmem:[%s1806_s4 + $0x70] sm:$0xff]  ;;  %v893_v28 = vld [vmem:[%s1807_s5 + $0x60] sm:$0xff]  ;;  %p1328_p11 = scmp.ne.s32.totalorder %s1762_s16, %s1327_s6  ;;  %p1335_p1 = scmp.lt.s32.totalorder %s1333_s10, %s1327_s6 }
  0x29   : > { %1263 = vmatprep.subr.msk.bf16.mxu0 %vm422_vm0, %v336_v29  ;;  %806 = vperm.xlu0 %1309, %v760_v49   ;;  %v768_v29 = vld [vmem:[%s1806_s4 + $0x78] sm:$0xff]  ;;  %v469_v30 = vsel %vm422_vm0, %v381_v23, 0  ;;  %v895_v33 = vld [vmem:[%s1807_s5 + $0x70] sm:$0xff]  ;;  %v1314_v36 = vld [vmem:[%s1804_s2 + $0x8] sm:$0xff]  }
  0x2a   : > { %924 = vperm.xlu1 %1310, %v886_v54   ;;  %v654_v31 = vsel %vm422_vm0, %v341_v25, 0  ;;  %v896_v35 = vld [vmem:[%s1807_s5 + $0x78] sm:$0xff]  ;;  %v1315_v37 = vld [vmem:[%s1805_s3 + $0x10] sm:$0xff]   ;;  %v1320_v42 = vld [vmem:[%s1804_s2 + $0x20] sm:$0xff]   ;;  %p1329_p12 = pnand %p1328_p11, %p1471_p5  ;;  %p1336_p2 = por %p1335_p1, %p1334_p0 }
  0x2b   : > { %v1321_v43 = vld [vmem:[%s1805_s3 + $0x28] sm:$0xff]   ;;  %v1323_v45 = vld [vmem:[%s1805_s3 + $0x30] sm:$0xff]   ;;  %v1325_v47 = vld [vmem:[%s1805_s3 + $0x38] sm:$0xff]  }
  0x2c   : > { %v1322_v44 = vld [vmem:[%s1804_s2 + $0x28] sm:$0xff]   ;;  %v1324_v46 = vld [vmem:[%s1804_s2 + $0x30] sm:$0xff]   ;;  %v1326_v48 = vld [vmem:[%s1804_s2 + $0x38] sm:$0xff]   ;;  %p1330_p13 = pneg %p1329_p12 }
  0x2d   : > { %811 = vperm.xlu0 %1309, %v761_v55  }
  0x2e   : > { %929 = vperm.xlu1 %1310, %v887_v60   ;;  %p1337_p3 = pnand %p1336_p2, %p1330_p13 }
  0x2f   : > { %1178 = vmatpush3.bf16.xpose.msra.mxu1 %v454_v38  ;;  %v1316_v38 = vld [vmem:[%s1804_s2 + $0x10] sm:$0xff]  }
  0x30   : > { %1210 = vmatpush3.bf16.xpose.msra.mxu0 %v639_v40  ;;  %1256 = vmatprep.subr.msk.bf16.mxu1 %vm422_vm0, %v377_v39  ;;  %v1317_v39 = vld [vmem:[%s1805_s3 + $0x18] sm:$0xff]  }
  0x31   : > { %1264 = vmatprep.subr.msk.bf16.mxu0 %vm422_vm0, %v337_v41  ;;  %816 = vperm.xlu0 %1309, %v762_v61   ;;  %v1318_v40 = vld [vmem:[%s1804_s2 + $0x18] sm:$0xff]   ;;  %v1319_v41 = vld [vmem:[%s1805_s3 + $0x20] sm:$0xff]  }
  0x32   : > { %934 = vperm.xlu1 %1310, %v888_v2  }
  0x35   : > { %821 = vperm.xlu0 %1309, %v763_v3  }
  0x36   : > { %939 = vperm.xlu1 %1310, %v889_v8  }
  0x37   : > { %1180 = vmatpush3.bf16.xpose.msra.mxu1 %v457_v50 }
  0x38   : > { %1212 = vmatpush3.bf16.xpose.msra.mxu0 %v642_v52  ;;  %1257 = vmatprep.subr.msk.bf16.mxu1 %vm422_vm0, %v378_v51 }
  0x39   : > { %1265 = vmatprep.subr.msk.bf16.mxu0 %vm422_vm0, %v338_v53  ;;  %826 = vperm.xlu0 %1309, %v764_v9  }
  0x3a   : > { %944 = vperm.xlu1 %1310, %v890_v14  }
  0x3d   : > { %831 = vperm.xlu0 %1309, %v765_v15  }
  0x3e   : > { %949 = vperm.xlu1 %1310, %v891_v20  }
  0x3f   : > { %1182 = vmatpush3.bf16.xpose.msra.mxu1 %v460_v62 }
  0x40   : > { %1214 = vmatpush3.bf16.xpose.msra.mxu0 %v645_v0  ;;  %1258 = vmatprep.subr.msk.bf16.mxu1 %vm422_vm0, %v379_v63 }
  0x41   : > { %1266 = vmatprep.subr.msk.bf16.mxu0 %vm422_vm0, %v339_v1  ;;  %836 = vperm.xlu0 %1309, %v766_v21  }
  0x42   : > { %954 = vperm.xlu1 %1310, %v892_v26  }
  0x45   : > { %841 = vperm.xlu0 %1309, %v767_v27  }
  0x46   : > { %959 = vperm.xlu1 %1310, %v893_v28  }
  0x47   : > { %1184 = vmatpush3.bf16.xpose.msra.mxu1 %v463_v10 }
  0x48   : > { %1216 = vmatpush3.bf16.xpose.msra.mxu0 %v648_v12  ;;  %1259 = vmatprep.subr.msk.bf16.mxu1 %vm422_vm0, %v380_v11 }
  0x49   : > { %1267 = vmatprep.subr.msk.bf16.mxu0 %vm422_vm0, %v340_v13  ;;  %846 = vperm.xlu0 %1309, %v768_v29  }
  0x4a   : > { %964 = vperm.xlu1 %1310, %v894_v32  }
  0x4d   : > { %969 = vperm.xlu0 %1309, %v895_v33  }
  0x4e   : > { %974 = vperm.xlu1 %1310, %v896_v35  }
  0x4f   : > { %1186 = vmatpush3.bf16.xpose.msra.mxu1 %v466_v22 }
  0x50   : > { %1218 = vmatpush3.bf16.xpose.msra.mxu0 %v651_v24  ;;  %1260 = vmatprep.subr.msk.bf16.mxu1 %vm422_vm0, %v381_v23 }
  0x51   : > { %1268 = vmatprep.subr.msk.bf16.mxu0 %vm422_vm0, %v341_v25 }
  0x57   : > { %1188 = vmatpush3.bf16.xpose.msra.mxu1 %v469_v30 }
  0x58   : > { %1220 = vmatpush3.bf16.xpose.msra.mxu0 %v654_v31 }
  0x5e   : > { %1190 = vmatmul.mubr.msk.bf16.vlgmr.msra.gmra.mrb[0].mxu1 %vm422_vm0, %v1313_v34 }
  0x5f   : > { %1222 = vmatmul.mubr.msk.bf16.vlgmr.msra.gmra.mrb[0].mxu0 %vm422_vm0, %v1314_v36  ;;  %1193 = vmatprep.mubr.msk.bf16.mxu1 %vm422_vm0, %v1315_v37 }
  0x60   : > { %1225 = vmatprep.mubr.msk.bf16.mxu0 %vm422_vm0, %v1316_v38 }
  0x66   : > { %1194 = vmatmul.mubr.msk.bf16.gmra.mrb[4].mxu1 %vm422_vm0, %v1317_v39 }
  0x67   : > { %1226 = vmatmul.mubr.msk.bf16.gmra.mrb[4].mxu0 %vm422_vm0, %v1318_v40  ;;  %1197 = vmatprep.mubr.msk.bf16.mxu1 %vm422_vm0, %v1319_v41 }
  0x68   : > { %1229 = vmatprep.mubr.msk.bf16.mxu0 %vm422_vm0, %v1320_v42 }
  0x6e   : > { %1198 = vmatmul.mubr.msk.bf16.gmra.mrb[8].mxu1 %vm422_vm0, %v1321_v43 }
  0x6f   : > { %1230 = vmatmul.mubr.msk.bf16.gmra.mrb[8].mxu0 %vm422_vm0, %v1322_v44  ;;  %1201 = vmatprep.mubr.msk.bf16.mxu1 %vm422_vm0, %v1323_v45 }
  0x70   : > { %1233 = vmatprep.mubr.msk.bf16.mxu0 %vm422_vm0, %v1324_v46 }
  0x76   : > { %1202 = vmatmul.mubr.msk.bf16.gmra.mrb[12].mxu1 %vm422_vm0, %v1325_v47 }
  0x77   : > { %1234 = vmatmul.mubr.msk.bf16.gmra.mrb[12].mxu0 %vm422_vm0, %v1326_v48 }
  0x90   : > { %v772_v49 = vpop.permute.xlu0 %771 }
  0x91   : > { %v782_v50 = vpop.permute.xlu1 %781 }
  0x94   : > { %v777_v51 = vpop.permute.xlu0 %776 }
  0x95   : > { %v787_v52 = vpop.permute.xlu1 %786 }
  0x98   : > { %v900_v53 = vpop.permute.xlu0 %899 }
  0x99   : > { %v905_v54 = vpop.permute.xlu1 %904 }
  0x9c   : > { %v792_v55 = vpop.permute.xlu0 %791 }
  0x9d   : > { %v910_v56 = vpop.permute.xlu1 %909 }
  0xa0   : > { %v797_v57 = vpop.permute.xlu0 %796 }
  0xa1   : > { %v915_v58 = vpop.permute.xlu1 %914 }
  0xa4   : > { %v802_v59 = vpop.permute.xlu0 %801 }
  0xa5   : > { %v920_v60 = vpop.permute.xlu1 %919 }
  0xa8   : > { %v807_v61 = vpop.permute.xlu0 %806 }
  0xa9   : > { %v1719_v62 = vpop.permute.xlu1 %924 }
  0xac   : > { %v1721_v63 = vpop.permute.xlu0 %811 }
  0xad   : > { %v1723_v0 = vpop.permute.xlu1 %929 }
  0xb0   : > { %v1725_v1 = vpop.permute.xlu0 %816 }
  0xb1   : > { %v1727_v2 = vpop.permute.xlu1 %934 }
  0xb4   : > { %v1729_v3 = vpop.permute.xlu0 %821 }
  0xb5   : > { %v1731_v4 = vpop.permute.xlu1 %939 }
  0xb8   : > { %v1733_v5 = vpop.permute.xlu0 %826 }
  0xb9   : > { %v1735_v6 = vpop.permute.xlu1 %944 }
  0xbc   : > { %v1737_v22 = vpop.permute.xlu0 %831 }
  0xbd   : > { %v1739_v25 = vpop.permute.xlu1 %949 }
  0xc0   : > { %v1741_v48 = vpop.permute.xlu0 %836 }
 0x131   : > { %v1191_v7 = vpop.f32.mrb[0].mxu1 }
 0x132   : > { %v1223_v8 = vpop.f32.mrb[0].mxu0  ;;  %v505_v9 = vpop.f32.mrb[1].mxu1 }
 0x133   : > { %v699_v10 = vadd.f32 %v1223_v8, %v1191_v7  ;;  %v690_v11 = vpop.f32.mrb[1].mxu0  ;;  %v1192_v12 = vpop.f32.mrb[2].mxu1 }
 0x134   : > { %v691_v13 = vadd.f32 %v690_v11, %v505_v9  ;;  %v1224_v14 = vpop.f32.mrb[2].mxu0  ;;  %v508_v15 = vpop.f32.mrb[3].mxu1 }
 0x135   : > { %v851_v16 = vadd.f32 %v782_v50, %v699_v10  ;;  %v702_v17 = vadd.f32 %v1224_v14, %v1192_v12  ;;  %v693_v18 = vpop.f32.mrb[3].mxu0  ;;  %v955_v7 = vpop.permute.xlu1 %954 }
 0x136   : > { %v849_v19 = vadd.f32 %v772_v49, %v691_v13  ;;  %v694_v20 = vadd.f32 %v693_v18, %v508_v15 }
 0x137   : > { %v852_v21 = vadd.f32 %v787_v52, %v702_v17  ;;  %v867_v26 = vmax.f32 %v851_v16, 0.0 }
 0x138   : > { %v865_v23 = vmax.f32 %v849_v19, 0.0  ;;  %v850_v24 = vadd.f32 %v777_v51, %v694_v20 }
 0x139   : > { %v1195_v27 = vpop.f32.mrb[4].mxu1  ;;  %v868_v31 = vmax.f32 %v852_v21, 0.0  ;;  %v979_v40 = vmul.f32 %v910_v56, %v867_v26 }
 0x13a   : > { %v866_v28 = vmax.f32 %v850_v24, 0.0  ;;  %v1227_v29 = vpop.f32.mrb[4].mxu0  ;;  %v521_v30 = vpop.f32.mrb[5].mxu1  ;;  %v977_v35 = vmul.f32 %v900_v53, %v865_v23 }
 0x13b   : > { %v715_v32 = vadd.f32 %v1227_v29, %v1195_v27  ;;  %v706_v33 = vpop.f32.mrb[5].mxu0  ;;  %v1196_v34 = vpop.f32.mrb[6].mxu1  ;;  %v980_v47 = vmul.f32 %v915_v58, %v868_v31 }
 0x13c   : > { %v978_v36 = vmul.f32 %v905_v54, %v866_v28  ;;  %v707_v37 = vadd.f32 %v706_v33, %v521_v30  ;;  %v1228_v38 = vpop.f32.mrb[6].mxu0  ;;  %v524_v39 = vpop.f32.mrb[7].mxu1 }
 0x13d   : > { %v718_v41 = vadd.f32 %v1228_v38, %v1196_v34  ;;  %v709_v42 = vpop.f32.mrb[7].mxu0  ;;  %v855_v44 = vadd.f32 %v802_v59, %v715_v32  ;;  %v842_v24 = vpop.permute.xlu0 %841 }
 0x13e   : > { %v993_v43 = vadd.f32 %v978_v36, %v977_v35  ;;  %v853_v45 = vadd.f32 %v792_v55, %v707_v37  ;;  %v710_v46 = vadd.f32 %v709_v42, %v524_v39  ;;  %v960_v29 = vpop.permute.xlu1 %959 }
 0x13f   : > { %v856_v51 = vadd.f32 %v807_v61, %v718_v41  ;;  %v871_v54 = vmax.f32 %v855_v44, 0.0 }
 0x140   : > { %v994_v49 = vadd.f32 %v993_v43, %v979_v40  ;;  %v869_v50 = vmax.f32 %v853_v45, 0.0  ;;  %v854_v52 = vadd.f32 %v797_v57, %v710_v46 }
 0x141   : > { %v1199_v53 = vpop.f32.mrb[8].mxu1  ;;  %v872_v14 = vmax.f32 %v856_v51, 0.0  ;;  %v847_v46 = vpop.permute.xlu0 %846 }
 0x142   : > { %v981_v8 = vmul.f32 %v920_v60, %v869_v50  ;;  %v995_v9 = vadd.f32 %v994_v49, %v980_v47  ;;  %v870_v10 = vmax.f32 %v854_v52, 0.0  ;;  %v1231_v56 = vpop.f32.mrb[8].mxu0  ;;  %v537_v11 = vpop.f32.mrb[9].mxu1  ;;  %v983_v60 = vmul.f32 %v1723_v0, %v871_v54 }
 0x143   : > { %v731_v12 = vadd.f32 %v1231_v56, %v1199_v53  ;;  %v722_v13 = vpop.f32.mrb[9].mxu0  ;;  %v1200_v59 = vpop.f32.mrb[10].mxu1  ;;  %v984_v26 = vmul.f32 %v1727_v2, %v872_v14 }
 0x144   : > { %v996_v55 = vadd.f32 %v995_v9, %v981_v8  ;;  %v982_v58 = vmul.f32 %v1719_v62, %v870_v10  ;;  %v723_v15 = vadd.f32 %v722_v13, %v537_v11  ;;  %v1232_v16 = vpop.f32.mrb[10].mxu0  ;;  %v540_v17 = vpop.f32.mrb[11].mxu1 }
 0x145   : > { %v859_v57 = vadd.f32 %v1729_v3, %v731_v12  ;;  %v734_v61 = vadd.f32 %v1232_v16, %v1200_v59  ;;  %v725_v18 = vpop.f32.mrb[11].mxu0  ;;  %v970_v11 = vpop.permute.xlu0 %969 }
 0x146   : > { %v997_v19 = vadd.f32 %v996_v55, %v982_v58  ;;  %v857_v20 = vadd.f32 %v1721_v63, %v723_v15  ;;  %v726_v21 = vadd.f32 %v725_v18, %v540_v17  ;;  %v1015_v17 = vstv %s1014_s20 }
 0x147   : > { %v860_v23 = vadd.f32 %v1733_v5, %v734_v61  ;;  %v875_v30 = vmax.f32 %v859_v57, 0.0 }
 0x148   : > { %v998_v27 = vadd.f32 %v997_v19, %v983_v60  ;;  %v873_v62 = vmax.f32 %v857_v20, 0.0  ;;  %v858_v28 = vadd.f32 %v1725_v1, %v726_v21 }
 0x149   : > { %v1203_v3 = vpop.f32.mrb[12].mxu1  ;;  %v876_v63 = vmax.f32 %v860_v23, 0.0  ;;  %v987_v1 = vmul.f32 %v1739_v25, %v875_v30 }
 0x14a   : > { %v985_v31 = vmul.f32 %v1731_v4, %v873_v62  ;;  %v999_v32 = vadd.f32 %v998_v27, %v984_v26  ;;  %v874_v0 = vmax.f32 %v858_v28, 0.0  ;;  %v1235_v33 = vpop.f32.mrb[12].mxu0  ;;  %v553_v34 = vpop.f32.mrb[13].mxu1 }
 0x14b   : > { %v747_v35 = vadd.f32 %v1235_v33, %v1203_v3  ;;  %v738_v36 = vpop.f32.mrb[13].mxu0  ;;  %v1204_v5 = vpop.f32.mrb[14].mxu1  ;;  %v988_v47 = vmul.f32 %v955_v7, %v876_v63 }
 0x14c   : > { %v1000_v37 = vadd.f32 %v999_v32, %v985_v31  ;;  %v986_v2 = vmul.f32 %v1735_v6, %v874_v0  ;;  %v739_v38 = vadd.f32 %v738_v36, %v553_v34  ;;  %v1236_v39 = vpop.f32.mrb[14].mxu0  ;;  %v556_v40 = vpop.f32.mrb[15].mxu1 }
 0x14d   : > { %v750_v41 = vadd.f32 %v1236_v39, %v1204_v5  ;;  %v741_v42 = vpop.f32.mrb[15].mxu0  ;;  %v863_v4 = vadd.f32 %v842_v24, %v747_v35  ;;  %v965_v6 = vpop.permute.xlu1 %964 }
 0x14e   : > { %v1001_v43 = vadd.f32 %v1000_v37, %v986_v2  ;;  %v861_v44 = vadd.f32 %v1737_v22, %v739_v38  ;;  %v742_v45 = vadd.f32 %v741_v42, %v556_v40 }
 0x14f   : > { %v864_v51 = vadd.f32 %v847_v46, %v750_v41  ;;  %v879_v53 = vmax.f32 %v863_v4, 0.0 }
 0x150   : > { %v1002_v49 = vadd.f32 %v1001_v43, %v987_v1  ;;  %v877_v50 = vmax.f32 %v861_v44, 0.0  ;;  %v862_v52 = vadd.f32 %v1741_v48, %v742_v45 }
 0x151   : > { %v880_v10 = vmax.f32 %v864_v51, 0.0  ;;  %v991_v12 = vmul.f32 %v970_v11, %v879_v53  ;;  %v975_v13 = vpop.permute.xlu1 %974 }
 0x152   : > { %v989_v54 = vmul.f32 %v960_v29, %v877_v50  ;;  %v1003_v8 = vadd.f32 %v1002_v49, %v988_v47  ;;  %v878_v25 = vmax.f32 %v862_v52, 0.0 }
 0x153   : > { %v992_v7 = vmul.f32 %v975_v13, %v880_v10 }
 0x154   : > { %v1004_v9 = vadd.f32 %v1003_v8, %v989_v54  ;;  %v990_v56 = vmul.f32 %v965_v6, %v878_v25 }
 0x156   : > { %v1005_v22 = vadd.f32 %v1004_v9, %v990_v56 }
 0x158   : > { %v1006_v59 = vadd.f32 %v1005_v22, %v991_v12 }
 0x15a   : > { %v1007_v55 = vadd.f32 %v1006_v59, %v992_v7 }
 0x15c   : > { %v1008_v14 = vrot.slane %v1007_v55, 4 }
 0x15e   : > { %v1009_v48 = vadd.f32 %v1008_v14, %v1007_v55 }
 0x160   : > { %v1010_v58 = vrot.slane %v1009_v48, 2 }
 0x162   : > { %v1011_v15 = vadd.f32 %v1010_v58, %v1009_v48 }
 0x164   : > { %v1012_v16 = vrot.slane %v1011_v15, 1 }
 0x166   : > { %v1013_v57 = vadd.f32 %v1012_v16, %v1011_v15 }
 0x168   : > { %v1016_v61 = vadd.f32 %v1015_v17, %v1013_v57 }
 0x16a   : > { %1017 = vst [vmem:[%s288_s22] sm:$0x1] %v1016_v61 }
 0x16b   : > { %1340 = shalt.err (!%p1337_p3)
}
 0x16c   : > { %s1341_s14 = scalar_lea.hbm %s1760_s24, 16  ;;  %s1345_s18 = scalar_lea.hbm %s1809_s7, 32 }
 0x16d   : > { %p1342_p4 = scmp.ne.s32.totalorder %s1760_s24, %s1341_s14  ;;  %p1346_p9 = scmp.lt.u32.totalorder %s1760_s24, %s1809_s7 }
 0x16e   : > { %p1347_p10 = scmp.lt.u32.totalorder %s1345_s18, %s1341_s14  ;;  %p1349_p12 = scmp.lt.u32.totalorder %s1341_s14, %s1760_s24 }
 0x16f   : > { %p1343_p7 = pnand %p1342_p4, %p1471_p5 }
 0x170   : > { %p1348_p11 = por %p1347_p10, %p1346_p9 }
 0x171   : > { %p1344_p8 = pneg %p1343_p7 }
 0x172   : > { %p1350_p13 = por %p1349_p12, %p1348_p11 }
 0x174   : > { %p1351_p0 = pnand %p1350_p13, %p1344_p8 }
 0x176   : > { %1354 = shalt.err (!%p1351_p0)
}
 0x177   : > { %1269 = dma.vmem_to_hbm [thread:$0]  (%p1471_p5), %s1762_s16, 16, %s1760_s24, %s1019_s25  }
 0x178 PF: > { %p1275_p1 = scmp.ge.s32.totalorder %s1389_s29, 2  ;;  %s1043_s22 = sand.u32 1, %s1377_s26  }
 0x179   : > { %s1044_s23 = scalar_lea.sflag [#allocation4], %s1043_s22 }
 0x17a   : > { %p1272_p2 = pnand %p1275_p1, %p1475_p6 }
 0x17c   : > { %1372 = dma.done.wait (!%p1272_p2), %s1044_s23, 16  }
 0x17d   : > { %1374 = vsyncadd (!%p1272_p2), %s1044_s23, 4294967280  ;;  %p18_p3 = scmp.ge.s32.totalorder %s1459_s8, 4   ;;  %s1812_s26 = smov %s1381_s27 }
 0x17e   : > { %s1813_s27 = smov %s1385_s28  ;;  %s1814_s28 = smov %s1469_s11 }
 0x17f   : > { %s1815_s29 = smov %s1459_s8  ;;  %20 = sbr.rel (!%p18_p3) target bundleno = 5 (0x5), region = 86 }
 0x186   :  { %1048 = vsyncpa [#allocation4], 1 }
 0x187   :  { %1050 = vsyncpa [#allocation4 + $0x1], 1 }

</bundles_post_ra>
